<compile_context>
chip_gen: v7x
topology: tpu7x:2x2x1
jax: 0.10.0
libtpu: 0.0.40
codegen_flags: <defaults>
</compile_context>

<pallas_src>
from functools import partial
from typing import List

import numpy as np
import jax
import jax.numpy as jnp
from jax.experimental import pallas as pl
from jax.experimental.pallas import tpu as pltpu


def _round_up(x: int, m: int) -> int:
    return ((x + m - 1) // m) * m


def _fused_embedding_linear_kernel(
    xin_ref,   # [TB, K_in]                 f32  ([x_num | 1 | idx])
    a_ref,     # [K_in, OUT_PAD+TOTAL_PAD]  f32  (fused W_num / bias / selector)
    col_ref,   # [1, TOTAL_PAD]             f32  (local row index per fused column, -1 pad)
    p_ref,     # [TOTAL_PAD, OUT_PAD]       f32  (stacked  emb_table_i @ W_cat_i)
    out_ref,   # [TB, OUT_PAD]              f32
    *,
    precision,
):
    out_pad = out_ref.shape[1]
    # One fused matmul: columns [:out_pad] = x_num @ W_num + b (ones-column trick),
    # columns [out_pad:] = each sample's table index broadcast over that table's columns.
    t = jnp.dot(xin_ref[...], a_ref[...], precision=precision,
                preferred_element_type=jnp.float32)
    lin = t[:, :out_pad]          # lane-aligned split (out_pad is a multiple of 128)
    target = t[:, out_pad:]
    # Single compare builds the combined one-hot over all tables. Targets and
    # local column ids are exact small integers; 0.5 margin absorbs matmul rounding.
    onehot = (jnp.abs(target - col_ref[...]) < 0.5).astype(jnp.float32)
    out_ref[...] = lin + jnp.dot(onehot, p_ref[...],
                                 preferred_element_type=jnp.float32)


class PallasEmbeddingModel:
    """JAX/Pallas port of BasePytorchEmbeddingModel (forward only)."""

    def __init__(
        self,
        input_dim: int,
        output_dim: int,
        categorical_idcs: List[int],
        categorical_sizes: List[int],
        categorical_embedding: List[int],
        key,
    ):
        assert len(categorical_idcs) >= 1, "embedding model needs >=1 categorical feature"
        self.input_dim = input_dim
        self.output_dim = output_dim
        self.categorical_idcs = list(categorical_idcs)
        self.categorical_sizes = list(categorical_sizes)
        self.categorical_embedding = list(categorical_embedding)
        # Pinned (sorted) order; matches CPython's set-of-small-ints iteration order.
        self.numerical_idcs = sorted(
            set(range(input_dim)).difference(set(categorical_idcs)))
        self.num_numerics = input_dim - len(categorical_idcs)
        self.combined_emb_dim = sum(categorical_embedding)
        self.expanded_dim = self.num_numerics + self.combined_emb_dim
        n_cat = len(categorical_idcs)

        # Deterministic parameter init (synthetic; shapes match the torch module).
        keys = jax.random.split(key, len(categorical_sizes) + 2)
        # nn.Embedding default init: N(0, 1)
        self.emb_tables = [
            jax.random.normal(
                keys[i], (categorical_sizes[i], categorical_embedding[i]),
                dtype=jnp.float32)
            for i in range(len(categorical_sizes))
        ]
        # nn.Linear default init: U(-1/sqrt(in), 1/sqrt(in)); stored as [in, out].
        bound = 1.0 / (self.expanded_dim ** 0.5)
        self.w = jax.random.uniform(
            keys[-2], (self.expanded_dim, self.output_dim),
            minval=-bound, maxval=bound, dtype=jnp.float32)
        self.b = jax.random.uniform(
            keys[-1], (1, self.output_dim),
            minval=-bound, maxval=bound, dtype=jnp.float32)

        # ---- Precompute fused, lane-dense kernel parameters ------------------
        self.out_pad = _round_up(output_dim, 128)
        # TODO(synk): if output_dim grows toward >=128, pad to 256 on v6e/v7x (2x256 MXU).

        w_cat = self.w[:self.combined_emb_dim]          # [sum(emb_dims), out]
        w_num = self.w[self.combined_emb_dim:]          # [num_numerics,  out]

        parts, bases = [], []
        row_off, total = 0, 0
        for i, table in enumerate(self.emb_tables):
            d = categorical_embedding[i]
            parts.append(table @ w_cat[row_off:row_off + d])   # P_i = T_i @ W_cat_i
            bases.append(total)
            total += int(categorical_sizes[i])
            row_off += d
        self.total_size = total
        self.total_pad = _round_up(total, 8)            # sublane-aligned rows

        p = jnp.concatenate(parts, axis=0)               # [total, out]
        self.p_fused = jnp.pad(
            p, ((0, self.total_pad - total), (0, self.out_pad - output_dim)))

        # Fused first-matmul weight A and the per-column local row ids.
        self.k_in = self.num_numerics + 1 + n_cat        # [x_num | 1 | idx]
        self.n_a = self.out_pad + self.total_pad
        a = np.zeros((self.k_in, self.n_a), np.float32)
        a[:self.num_numerics, :output_dim] = np.asarray(w_num)
        a[self.num_numerics, :output_dim] = np.asarray(self.b[0])   # bias via ones-column
        local_col = np.full((1, self.total_pad), -1.0, np.float32)  # pad cols never match
        for t in range(n_cat):
            sz = int(categorical_sizes[t])
            a[self.num_numerics + 1 + t,
              self.out_pad + bases[t]: self.out_pad + bases[t] + sz] = 1.0
            local_col[0, bases[t]: bases[t] + sz] = np.arange(sz, dtype=np.float32)
        self.a_mat = jnp.asarray(a)
        self.local_col = jnp.asarray(local_col)
        self.sizes_minus1 = jnp.asarray(
            np.asarray(categorical_sizes, np.int32) - 1)

        # Chosen lazily on first call: (single_buffer_residents, matmul precision).
        self._kernel_cfg = None

        # TODO(synk): for vocabularies beyond ~30k total rows, keep p_fused in HBM
        # (memory_space=pl.ANY) and gather rows with scalar-prefetched indices +
        # manual make_async_copy double-buffering instead of the one-hot matmul.

    # ------------------------------------------------------------------ pallas
    def _pallas_forward(self, xin, tb, single_buffer, precision):
        b_pad, k_in = xin.shape
        out_pad, total_pad, n_a = self.out_pad, self.total_pad, self.n_a
        resident_kw = {"pipeline_mode": pl.Buffered(1)} if single_buffer else {}

        # Explicit VMEM budget: resident params (x2 in case single-buffering is
        # unavailable) + double-buffered activation/output tiles + headroom,
        # clamped to [32 MiB, 64 MiB] (v7x physical VMEM is 64 MiB).
        resident = 4 * (k_in * n_a + total_pad + total_pad * out_pad)
        streamed = 4 * 2 * (tb * k_in + tb * out_pad)
        vmem_limit = int(min(max(2 * resident + streamed + (8 << 20), 32 << 20),
                             64 << 20))

        kernel = partial(_fused_embedding_linear_kernel, precision=precision)
        return pl.pallas_call(
            kernel,
            out_shape=jax.ShapeDtypeStruct((b_pad, out_pad), jnp.float32),
            grid=(b_pad // tb,),
            in_specs=[
                pl.BlockSpec((tb, k_in), lambda i: (i, 0)),            # activations (streamed)
                pl.BlockSpec((k_in, n_a), lambda i: (0, 0),
                             **resident_kw),                           # fused W/bias/selector
                pl.BlockSpec((1, total_pad), lambda i: (0, 0),
                             **resident_kw),                           # local column ids
                pl.BlockSpec((total_pad, out_pad), lambda i: (0, 0),
                             **resident_kw),                           # projected emb tables
            ],
            out_specs=pl.BlockSpec((tb, out_pad), lambda i: (i, 0)),   # lane-dense output
            compiler_params=pltpu.CompilerParams(
                dimension_semantics=("parallel",),
                vmem_limit_bytes=vmem_limit),
        )(xin, self.a_mat, self.local_col, self.p_fused)

    # ------------------------------------------------------------------ public
    def __call__(self, x: jnp.ndarray) -> jnp.ndarray:
        batch = x.shape[0]
        # Glue (plain JAX): column split, index clamp, single lane-dense slab.
        idx = x[:, jnp.array(self.categorical_idcs, jnp.int32)].astype(jnp.int32)
        idx = jnp.clip(idx, 0, self.sizes_minus1[None, :])
        x_num = x[:, jnp.array(self.numerical_idcs, jnp.int32)].astype(jnp.float32)
        ones = jnp.ones((batch, 1), jnp.float32)
        xin = jnp.concatenate([x_num, ones, idx.astype(jnp.float32)], axis=1)

        # Batch tile: up to 512 rows; guarantee >=2 grid steps above 16 rows so
        # both v7x TensorCores get work; always a sublane (8) multiple.
        if batch <= 16:
            tb = max(8, _round_up(batch, 8))
        else:
            tb = min(512, _round_up((batch + 1) // 2, 8))
        b_pad = _round_up(batch, tb)
        if b_pad != batch:
            xin = jnp.pad(xin, ((0, b_pad - batch), (0, 0)))

        if self._kernel_cfg is None:
            # Probe the most optimized configuration first; fall back if this JAX
            # build rejects single-buffered residents or HIGHEST matmul precision.
            errs = []
            out = None
            for cfg in ((True, jax.lax.Precision.HIGHEST),
                        (False, jax.lax.Precision.HIGHEST),
                        (False, None)):
                try:
                    out = jax.block_until_ready(self._pallas_forward(xin, tb, *cfg))
                    self._kernel_cfg = cfg
                    break
                except Exception as e:          # noqa: BLE001 - fall through to next cfg
                    errs.append(e)
            if out is None:
                raise errs[-1]
        else:
            out = self._pallas_forward(xin, tb, *self._kernel_cfg)

        return out[:batch, :self.output_dim]

    # Pure-JAX reference (mirrors the torch forward) for sanity checking.
    def reference(self, x: jnp.ndarray) -> jnp.ndarray:
        x_cat_parts = []
        for i, j in enumerate(self.categorical_idcs):
            idx = x[:, j].astype(jnp.int32)
            x_cat_parts.append(self.emb_tables[i][idx])
        x_cat = jnp.concatenate(x_cat_parts, axis=1)
        x_num = x[:, jnp.array(self.numerical_idcs, jnp.int32)]
        feats = jnp.concatenate([x_cat, x_num], axis=1)
        return feats @ self.w + self.b


def _make_input(key, batch, input_dim, categorical_idcs, categorical_sizes):
    k_num, *k_cat = jax.random.split(key, 1 + len(categorical_idcs))
    x = jax.random.normal(k_num, (batch, input_dim), dtype=jnp.float32)
    for t, col in enumerate(categorical_idcs):
        c = jax.random.randint(k_cat[t], (batch,), 0,
                               categorical_sizes[t]).astype(jnp.float32)
        x = x.at[:, col].set(c)
    return x


if __name__ == "__main__":
    # Small config consistent with the module's forward.
    input_dim = 6
    output_dim = 5
    categorical_idcs = [1, 3]
    categorical_sizes = [10, 7]
    categorical_embedding = [4, 3]

    key = jax.random.PRNGKey(0)
    k_model, k_x1, k_x2 = jax.random.split(key, 3)

    model = PallasEmbeddingModel(
        input_dim, output_dim, categorical_idcs, categorical_sizes,
        categorical_embedding, k_model)

    # Single-tile path (batch=8).
    x1 = _make_input(k_x1, 8, input_dim, categorical_idcs, categorical_sizes)
    y1 = jax.block_until_ready(model(x1))
    assert y1.shape == (8, output_dim)
    assert jnp.allclose(y1, model.reference(x1), atol=1e-5, rtol=1e-5)

    # Multi-step grid + padded-batch path (batch=40 -> 2 parallel grid steps).
    x2 = _make_input(k_x2, 40, input_dim, categorical_idcs, categorical_sizes)
    y2 = jax.block_until_ready(model(x2))
    assert y2.shape == (40, output_dim)
    assert jnp.allclose(y2, model.reference(x2), atol=1e-5, rtol=1e-5)

    print("KERNEL_OK")
</pallas_src>

<mosaic_0001>
module attributes {stable_mosaic.version = 11 : i64} {
  func.func @_fused_embedding_linear_kernel(%arg0: i32, %arg1: memref<8x7xf32, #tpu.memory_space<vmem>>, %arg2: memref<7x152xf32, #tpu.memory_space<vmem>>, %arg3: memref<1x24xf32, #tpu.memory_space<vmem>>, %arg4: memref<24x128xf32, #tpu.memory_space<vmem>>, %arg5: memref<8x128xf32, #tpu.memory_space<vmem>>) attributes {dimension_semantics = [#tpu.dimension_semantics<parallel>], iteration_bounds = array<i64: 1>, scalar_prefetch = 0 : i64, scratch_operands = 0 : i64, tpu.core_type = #tpu.core_type<tc>, window_params = [{transform_indices = @transform_0, window_bounds = array<i64: 8, 7>}, {pipeline_mode = #tpu.pipeline_mode<synchronous>, transform_indices = @transform_1, window_bounds = array<i64: 7, 152>}, {pipeline_mode = #tpu.pipeline_mode<synchronous>, transform_indices = @transform_2, window_bounds = array<i64: 1, 24>}, {pipeline_mode = #tpu.pipeline_mode<synchronous>, transform_indices = @transform_3, window_bounds = array<i64: 24, 128>}, {transform_indices = @transform_4, window_bounds = array<i64: 8, 128>}]} {
    %c0 = arith.constant 0 : index
    %c0_0 = arith.constant 0 : index
    %0 = vector.load %arg1[%c0, %c0_0] : memref<8x7xf32, #tpu.memory_space<vmem>>, vector<8x7xf32>
    %c0_1 = arith.constant 0 : index
    %c0_2 = arith.constant 0 : index
    %1 = vector.load %arg2[%c0_1, %c0_2] : memref<7x152xf32, #tpu.memory_space<vmem>>, vector<7x152xf32>
    %cst = arith.constant dense<0.000000e+00> : vector<8x152xf32>
    %2 = tpu.matmul %0, %1, %cst {dimension_numbers = #tpu.dot_dimension_numbers<[1], [0], [0], [1], [0, 0, 1, 1], [], []>, precision = #tpu.contract_precision<fp32>} : vector<8x7xf32>, vector<7x152xf32>, vector<8x152xf32> -> vector<8x152xf32>
    %3 = vector.extract_strided_slice %2 {offsets = [0, 0], sizes = [8, 128], strides = [1, 1]} : vector<8x152xf32> to vector<8x128xf32>
    %4 = vector.extract_strided_slice %2 {offsets = [0, 128], sizes = [8, 24], strides = [1, 1]} : vector<8x152xf32> to vector<8x24xf32>
    %c0_3 = arith.constant 0 : index
    %c0_4 = arith.constant 0 : index
    %5 = vector.load %arg3[%c0_3, %c0_4] : memref<1x24xf32, #tpu.memory_space<vmem>>, vector<1x24xf32>
    %6 = vector.broadcast %5 : vector<1x24xf32> to vector<8x24xf32>
    %7 = arith.subf %4, %6 : vector<8x24xf32>
    %8 = math.absf %7 : vector<8x24xf32>
    %cst_5 = arith.constant 5.000000e-01 : f32
    %9 = vector.broadcast %cst_5 : f32 to vector<8x24xf32>
    %10 = arith.cmpf olt, %8, %9 : vector<8x24xf32>
    %11 = arith.extui %10 : vector<8x24xi1> to vector<8x24xi32>
    %12 = arith.sitofp %11 : vector<8x24xi32> to vector<8x24xf32>
    %c0_6 = arith.constant 0 : index
    %c0_7 = arith.constant 0 : index
    %13 = vector.load %arg4[%c0_6, %c0_7] : memref<24x128xf32, #tpu.memory_space<vmem>>, vector<24x128xf32>
    %cst_8 = arith.constant dense<0.000000e+00> : vector<8x128xf32>
    %14 = tpu.matmul %12, %13, %cst_8 {dimension_numbers = #tpu.dot_dimension_numbers<[1], [0], [0], [1], [0, 0, 1, 1], [], []>} : vector<8x24xf32>, vector<24x128xf32>, vector<8x128xf32> -> vector<8x128xf32>
    %15 = arith.addf %3, %14 : vector<8x128xf32>
    %c0_9 = arith.constant 0 : index
    %c0_10 = arith.constant 0 : index
    %16 = vector.load %arg5[%c0_9, %c0_10] : memref<8x128xf32, #tpu.memory_space<vmem>>, vector<8x128xf32>
    tpu.vector_store %arg5[%c0_9, %c0_10], %15 {strides = array<i32>} : memref<8x128xf32, #tpu.memory_space<vmem>>, vector<8x128xf32>,
    return
  }
  func.func @transform_0(%arg0: i32) -> (i32, i32) {
    %c0_i32 = arith.constant 0 : i32
    %c0_i32_0 = arith.constant 0 : i32
    return %arg0, %c0_i32 : i32, i32
  }
  func.func @transform_1(%arg0: i32) -> (i32, i32) {
    %c0_i32 = arith.constant 0 : i32
    %c0_i32_0 = arith.constant 0 : i32
    %c0_i32_1 = arith.constant 0 : i32
    return %c0_i32, %c0_i32_0 : i32, i32
  }
  func.func @transform_2(%arg0: i32) -> (i32, i32) {
    %c0_i32 = arith.constant 0 : i32
    %c0_i32_0 = arith.constant 0 : i32
    %c0_i32_1 = arith.constant 0 : i32
    return %c0_i32, %c0_i32_0 : i32, i32
  }
  func.func @transform_3(%arg0: i32) -> (i32, i32) {
    %c0_i32 = arith.constant 0 : i32
    %c0_i32_0 = arith.constant 0 : i32
    %c0_i32_1 = arith.constant 0 : i32
    return %c0_i32, %c0_i32_0 : i32, i32
  }
  func.func @transform_4(%arg0: i32) -> (i32, i32) {
    %c0_i32 = arith.constant 0 : i32
    %c0_i32_0 = arith.constant 0 : i32
    return %arg0, %c0_i32 : i32, i32
  }
}

module attributes {stable_mosaic.version = 11 : i64} {
  func.func @_fused_embedding_linear_kernel(%arg0: i32, %arg1: memref<8x7xf32, #tpu.memory_space<vmem>>, %arg2: memref<7x152xf32, #tpu.memory_space<vmem>>, %arg3: memref<1x24xf32, #tpu.memory_space<vmem>>, %arg4: memref<24x128xf32, #tpu.memory_space<vmem>>, %arg5: memref<8x128xf32, #tpu.memory_space<vmem>>) attributes {dimension_semantics = [#tpu.dimension_semantics<parallel>], iteration_bounds = array<i64: 1>, scalar_prefetch = 0 : i64, scratch_operands = 0 : i64, tpu.core_type = #tpu.core_type<tc>, window_params = [{transform_indices = @transform_0, window_bounds = array<i64: 8, 7>}, {pipeline_mode = #tpu.pipeline_mode<synchronous>, transform_indices = @transform_1, window_bounds = array<i64: 7, 152>}, {pipeline_mode = #tpu.pipeline_mode<synchronous>, transform_indices = @transform_2, window_bounds = array<i64: 1, 24>}, {pipeline_mode = #tpu.pipeline_mode<synchronous>, transform_indices = @transform_3, window_bounds = array<i64: 24, 128>}, {transform_indices = @transform_4, window_bounds = array<i64: 8, 128>}]} {
    %c0 = arith.constant 0 : index
    %c0_0 = arith.constant 0 : index
    %0 = vector.load %arg1[%c0, %c0_0] : memref<8x7xf32, #tpu.memory_space<vmem>>, vector<8x7xf32>
    %c0_1 = arith.constant 0 : index
    %c0_2 = arith.constant 0 : index
    %1 = vector.load %arg2[%c0_1, %c0_2] : memref<7x152xf32, #tpu.memory_space<vmem>>, vector<7x152xf32>
    %cst = arith.constant dense<0.000000e+00> : vector<8x152xf32>
    %2 = tpu.matmul %0, %1, %cst {dimension_numbers = #tpu.dot_dimension_numbers<[1], [0], [0], [1], [0, 0, 1, 1], [], []>, precision = #tpu.contract_precision<fp32>} : vector<8x7xf32>, vector<7x152xf32>, vector<8x152xf32> -> vector<8x152xf32>
    %3 = vector.extract_strided_slice %2 {offsets = [0, 0], sizes = [8, 128], strides = [1, 1]} : vector<8x152xf32> to vector<8x128xf32>
    %4 = vector.extract_strided_slice %2 {offsets = [0, 128], sizes = [8, 24], strides = [1, 1]} : vector<8x152xf32> to vector<8x24xf32>
    %c0_3 = arith.constant 0 : index
    %c0_4 = arith.constant 0 : index
    %5 = vector.load %arg3[%c0_3, %c0_4] : memref<1x24xf32, #tpu.memory_space<vmem>>, vector<1x24xf32>
    %6 = vector.broadcast %5 : vector<1x24xf32> to vector<8x24xf32>
    %7 = arith.subf %4, %6 : vector<8x24xf32>
    %8 = math.absf %7 : vector<8x24xf32>
    %cst_5 = arith.constant 5.000000e-01 : f32
    %9 = vector.broadcast %cst_5 : f32 to vector<8x24xf32>
    %10 = arith.cmpf olt, %8, %9 : vector<8x24xf32>
    %11 = arith.extui %10 : vector<8x24xi1> to vector<8x24xi32>
    %12 = arith.sitofp %11 : vector<8x24xi32> to vector<8x24xf32>
    %c0_6 = arith.constant 0 : index
    %c0_7 = arith.constant 0 : index
    %13 = vector.load %arg4[%c0_6, %c0_7] : memref<24x128xf32, #tpu.memory_space<vmem>>, vector<24x128xf32>
    %cst_8 = arith.constant dense<0.000000e+00> : vector<8x128xf32>
    %14 = tpu.matmul %12, %13, %cst_8 {dimension_numbers = #tpu.dot_dimension_numbers<[1], [0], [0], [1], [0, 0, 1, 1], [], []>} : vector<8x24xf32>, vector<24x128xf32>, vector<8x128xf32> -> vector<8x128xf32>
    %15 = arith.addf %3, %14 : vector<8x128xf32>
    %c0_9 = arith.constant 0 : index
    %c0_10 = arith.constant 0 : index
    %16 = vector.load %arg5[%c0_9, %c0_10] : memref<8x128xf32, #tpu.memory_space<vmem>>, vector<8x128xf32>
    tpu.vector_store %arg5[%c0_9, %c0_10], %15 {strides = array<i32>} : memref<8x128xf32, #tpu.memory_space<vmem>>, vector<8x128xf32>,
    return
  }
  func.func @transform_0(%arg0: i32) -> (i32, i32) {
    %c0_i32 = arith.constant 0 : i32
    %c0_i32_0 = arith.constant 0 : i32
    return %arg0, %c0_i32 : i32, i32
  }
  func.func @transform_1(%arg0: i32) -> (i32, i32) {
    %c0_i32 = arith.constant 0 : i32
    %c0_i32_0 = arith.constant 0 : i32
    %c0_i32_1 = arith.constant 0 : i32
    return %c0_i32, %c0_i32_0 : i32, i32
  }
  func.func @transform_2(%arg0: i32) -> (i32, i32) {
    %c0_i32 = arith.constant 0 : i32
    %c0_i32_0 = arith.constant 0 : i32
    %c0_i32_1 = arith.constant 0 : i32
    return %c0_i32, %c0_i32_0 : i32, i32
  }
  func.func @transform_3(%arg0: i32) -> (i32, i32) {
    %c0_i32 = arith.constant 0 : i32
    %c0_i32_0 = arith.constant 0 : i32
    %c0_i32_1 = arith.constant 0 : i32
    return %c0_i32, %c0_i32_0 : i32, i32
  }
  func.func @transform_4(%arg0: i32) -> (i32, i32) {
    %c0_i32 = arith.constant 0 : i32
    %c0_i32_0 = arith.constant 0 : i32
    return %arg0, %c0_i32 : i32, i32
  }
}

module attributes {stable_mosaic.version = 11 : i64} {
  func.func @_fused_embedding_linear_kernel(%arg0: i32, %arg1: memref<8x7xf32, #tpu.memory_space<vmem>>, %arg2: memref<7x152xf32, #tpu.memory_space<vmem>>, %arg3: memref<1x24xf32, #tpu.memory_space<vmem>>, %arg4: memref<24x128xf32, #tpu.memory_space<vmem>>, %arg5: memref<8x128xf32, #tpu.memory_space<vmem>>) attributes {dimension_semantics = [#tpu.dimension_semantics<parallel>], iteration_bounds = array<i64: 1>, scalar_prefetch = 0 : i64, scratch_operands = 0 : i64, tpu.core_type = #tpu.core_type<tc>, window_params = [{transform_indices = @transform_0, window_bounds = array<i64: 8, 7>}, {pipeline_mode = #tpu.pipeline_mode<synchronous>, transform_indices = @transform_1, window_bounds = array<i64: 7, 152>}, {pipeline_mode = #tpu.pipeline_mode<synchronous>, transform_indices = @transform_2, window_bounds = array<i64: 1, 24>}, {pipeline_mode = #tpu.pipeline_mode<synchronous>, transform_indices = @transform_3, window_bounds = array<i64: 24, 128>}, {transform_indices = @transform_4, window_bounds = array<i64: 8, 128>}]} {
    %c0 = arith.constant 0 : index
    %c0_0 = arith.constant 0 : index
    %0 = vector.load %arg1[%c0, %c0_0] : memref<8x7xf32, #tpu.memory_space<vmem>>, vector<8x7xf32>
    %c0_1 = arith.constant 0 : index
    %c0_2 = arith.constant 0 : index
    %1 = vector.load %arg2[%c0_1, %c0_2] : memref<7x152xf32, #tpu.memory_space<vmem>>, vector<7x152xf32>
    %cst = arith.constant dense<0.000000e+00> : vector<8x152xf32>
    %2 = tpu.matmul %0, %1, %cst {dimension_numbers = #tpu.dot_dimension_numbers<[1], [0], [0], [1], [0, 0, 1, 1], [], []>} : vector<8x7xf32>, vector<7x152xf32>, vector<8x152xf32> -> vector<8x152xf32>
    %3 = vector.extract_strided_slice %2 {offsets = [0, 0], sizes = [8, 128], strides = [1, 1]} : vector<8x152xf32> to vector<8x128xf32>
    %4 = vector.extract_strided_slice %2 {offsets = [0, 128], sizes = [8, 24], strides = [1, 1]} : vector<8x152xf32> to vector<8x24xf32>
    %c0_3 = arith.constant 0 : index
    %c0_4 = arith.constant 0 : index
    %5 = vector.load %arg3[%c0_3, %c0_4] : memref<1x24xf32, #tpu.memory_space<vmem>>, vector<1x24xf32>
    %6 = vector.broadcast %5 : vector<1x24xf32> to vector<8x24xf32>
    %7 = arith.subf %4, %6 : vector<8x24xf32>
    %8 = math.absf %7 : vector<8x24xf32>
    %cst_5 = arith.constant 5.000000e-01 : f32
    %9 = vector.broadcast %cst_5 : f32 to vector<8x24xf32>
    %10 = arith.cmpf olt, %8, %9 : vector<8x24xf32>
    %11 = arith.extui %10 : vector<8x24xi1> to vector<8x24xi32>
    %12 = arith.sitofp %11 : vector<8x24xi32> to vector<8x24xf32>
    %c0_6 = arith.constant 0 : index
    %c0_7 = arith.constant 0 : index
    %13 = vector.load %arg4[%c0_6, %c0_7] : memref<24x128xf32, #tpu.memory_space<vmem>>, vector<24x128xf32>
    %cst_8 = arith.constant dense<0.000000e+00> : vector<8x128xf32>
    %14 = tpu.matmul %12, %13, %cst_8 {dimension_numbers = #tpu.dot_dimension_numbers<[1], [0], [0], [1], [0, 0, 1, 1], [], []>} : vector<8x24xf32>, vector<24x128xf32>, vector<8x128xf32> -> vector<8x128xf32>
    %15 = arith.addf %3, %14 : vector<8x128xf32>
    %c0_9 = arith.constant 0 : index
    %c0_10 = arith.constant 0 : index
    %16 = vector.load %arg5[%c0_9, %c0_10] : memref<8x128xf32, #tpu.memory_space<vmem>>, vector<8x128xf32>
    tpu.vector_store %arg5[%c0_9, %c0_10], %15 {strides = array<i32>} : memref<8x128xf32, #tpu.memory_space<vmem>>, vector<8x128xf32>,
    return
  }
  func.func @transform_0(%arg0: i32) -> (i32, i32) {
    %c0_i32 = arith.constant 0 : i32
    %c0_i32_0 = arith.constant 0 : i32
    return %arg0, %c0_i32 : i32, i32
  }
  func.func @transform_1(%arg0: i32) -> (i32, i32) {
    %c0_i32 = arith.constant 0 : i32
    %c0_i32_0 = arith.constant 0 : i32
    %c0_i32_1 = arith.constant 0 : i32
    return %c0_i32, %c0_i32_0 : i32, i32
  }
  func.func @transform_2(%arg0: i32) -> (i32, i32) {
    %c0_i32 = arith.constant 0 : i32
    %c0_i32_0 = arith.constant 0 : i32
    %c0_i32_1 = arith.constant 0 : i32
    return %c0_i32, %c0_i32_0 : i32, i32
  }
  func.func @transform_3(%arg0: i32) -> (i32, i32) {
    %c0_i32 = arith.constant 0 : i32
    %c0_i32_0 = arith.constant 0 : i32
    %c0_i32_1 = arith.constant 0 : i32
    return %c0_i32, %c0_i32_0 : i32, i32
  }
  func.func @transform_4(%arg0: i32) -> (i32, i32) {
    %c0_i32 = arith.constant 0 : i32
    %c0_i32_0 = arith.constant 0 : i32
    return %arg0, %c0_i32 : i32, i32
  }
}

</mosaic_0001>

<bundles_post_ra>
// kernel: tpu_custom_call.1
= control target key start
LH: loop header
LB: loop body
LE: loop exit
PB: predicated region body
PF: predicated region fallthrough
CT: control target
= control target key end

     0   :  { %9 = vsyncpa [#allocation3], 0  ;;  %s867_s0 = inlined_call_operand.hbm [shape: f32[8,7], index: 0, kind: input, shape index: {}]   ;;  %s868_s1 = inlined_call_operand.hbm [shape: f32[7,152], index: 1, kind: input, shape index: {}]   ;;  %s869_s2 = inlined_call_operand.vmem [shape: f32[1,24], index: 2, kind: input, shape index: {}]   ;;  %s870_s3 = inlined_call_operand.hbm [shape: f32[24,128], index: 3, kind: input, shape index: {}]   ;;  %s871_s4 = inlined_call_operand.hbm [shape: f32[8,128], index: 4, kind: output, shape index: {}]  }
   0x1   :  { %10 = vsyncpa [#allocation6], 0 }
   0x2   :  { %11 = vsyncpa [#allocation4], 0  ;;  %s773_s15 = smov [#allocation5]   ;;  %s774_s17 = smov [#allocation2]  }
   0x3   :  { %s28_s16 = sshll.u32 %s773_s15, 4  ;;  %s18_s18 = sshll.u32 %s774_s17, 4  ;;  %s29_s16 = int_to_ptr.vmem [resolvable:$true] %s28_s16  ;;  %s19_s18 = int_to_ptr.vmem [resolvable:$true] %s18_s18 }
   0x4   :  { %s679_s21 = scalar_lea.hbm %s868_s1, 256 }
   0x5   :  { %p680_p0 = scmp.ne.s32.totalorder %s868_s1, %s679_s21  ;;  %p683_p1 = scmp.lt.u32.totalorder %s679_s21, %s868_s1 }
   0x7   :  { %p685_p2 = pnand %p683_p1, %p680_p0 }
   0x9   :  { %688 = shalt.err (!%p685_p2)
}
   0xa   :  { %s689_s26 = scalar_lea.vmem %s29_s16, 256  ;;  %p694_p4 = scmp.lt.s32.totalorder %s29_s16, %s29_s16 }
   0xb   :  { %p690_p3 = scmp.ne.s32.totalorder %s29_s16, %s689_s26  ;;  %p695_p5 = scmp.lt.s32.totalorder %s689_s26, %s689_s26 }
   0xd   :  { %p696_p6 = por %p695_p5, %p694_p4 }
   0xf   :  { %p697_p7 = pnand %p696_p6, %p690_p3 }
  0x11   :  { %700 = shalt.err (!%p697_p7)
}
  0x12   :  { %31 = dma.hbm_to_vmem [thread:$0]  %s868_s1, 256, %s29_s16, [#allocation6]  }
  0x13   :  { %s701_s5 = scalar_lea.hbm %s867_s0, 128 }
  0x14   :  { %p702_p8 = scmp.ne.s32.totalorder %s867_s0, %s701_s5  ;;  %p705_p9 = scmp.lt.u32.totalorder %s701_s5, %s867_s0 }
  0x16   :  { %p707_p10 = pnand %p705_p9, %p702_p8 }
  0x18   :  { %710 = shalt.err (!%p707_p10)
}
  0x19   :  { %s711_s10 = scalar_lea.vmem %s19_s18, 128  ;;  %p716_p12 = scmp.lt.s32.totalorder %s19_s18, %s19_s18 }
  0x1a   :  { %p712_p11 = scmp.ne.s32.totalorder %s19_s18, %s711_s10  ;;  %p717_p13 = scmp.lt.s32.totalorder %s711_s10, %s711_s10 }
  0x1c   :  { %p718_p0 = por %p717_p13, %p716_p12 }
  0x1e   :  { %p719_p1 = pnand %p718_p0, %p712_p11 }
  0x20   :  { %722 = shalt.err (!%p719_p1)
}
  0x21   :  { %21 = dma.hbm_to_vmem [thread:$0]  %s867_s0, 128, %s19_s18, [#allocation3]  }
  0x22   :  { %s775_s12 = smov [#allocation7]   ;;  %s723_s16 = scalar_lea.hbm %s870_s3, 384 }
  0x23   :  { %s39_s13 = sshll.u32 %s775_s12, 4  ;;  %p724_p2 = scmp.ne.s32.totalorder %s870_s3, %s723_s16  ;;  %s40_s13 = int_to_ptr.vmem [resolvable:$true] %s39_s13 }
  0x24   :  { %p727_p3 = scmp.lt.u32.totalorder %s723_s16, %s870_s3 }
  0x26   :  { %p729_p4 = pnand %p727_p3, %p724_p2 }
  0x28   :  { %732 = shalt.err (!%p729_p4)
}
  0x29   :  { %s733_s22 = scalar_lea.vmem %s40_s13, 384  ;;  %p738_p6 = scmp.lt.s32.totalorder %s40_s13, %s40_s13 }
  0x2a   :  { %p734_p5 = scmp.ne.s32.totalorder %s40_s13, %s733_s22  ;;  %p739_p7 = scmp.lt.s32.totalorder %s733_s22, %s733_s22 }
  0x2c   :  { %p740_p8 = por %p739_p7, %p738_p6 }
  0x2e   :  { %p741_p9 = pnand %p740_p8, %p734_p5 }
  0x30   :  { %744 = shalt.err (!%p741_p9)
}
  0x31   :  { %s776_s0 = smov 128   ;;  %s777_s18 = smov 8  }
  0x32   :  { %45 = dma.hbm_to_vmem [thread:$0]  %s870_s3, 384, %s40_s13, [#allocation6], %s776_s0, %s776_s0, %s777_s18  }
  0x33   :  { %767 = dma.done.wait [#allocation3], 128  }
  0x34   :  { %768 = vsyncadd [#allocation3], 4294967168 }
  0x35   :  { %769 = dma.done.wait [#allocation6], 640  }
  0x36   :  { %770 = vsyncadd [#allocation6], 4294966656  ;;  %v778_v0 = vmov 0.0   ;;  %vm62_vm0 = vcmask 1046528   ;;  %vm58_vm1 = vcmask 56320   ;;  %v55_v3 = vld [vmem:[#allocation2] sm:$0xff] }
  0x37   :  { %297 = vmatprep.mubr.f32.mxu0 %v778_v0  ;;  %135 = vmatprep.mubr.f32.mxu1 %v778_v0  ;;  %v57_v1 = vld [vmem:[#allocation5 + $0x8] sm:$0x7f]  ;;  %v56_v2 = vld [vmem:[#allocation5] sm:$0x7f]  ;;  %v60_v6 = vsel %vm58_vm1, %v55_v3, 0  ;;  %v546_v22 = vld [vmem:[#allocation7] sm:$0xff] }
  0x38   :  { %v67_v4 = vsel %vm62_vm0, %v57_v1, 0  ;;  %v64_v5 = vsel %vm62_vm0, %v56_v2, 0  ;;  %v136_v9 = vand.u32 4294901760, %v60_v6  ;;  %v547_v23 = vld [vmem:[#allocation7 + $0x8] sm:$0xff]  ;;  %v779_v25 = vmov 0.0|0.0   ;;  %v548_v26 = vld [vmem:[#allocation7 + $0x10] sm:$0xff] }
  0x39   :  { %v69_v7 = vand.u32 4294901760, %v67_v4  ;;  %v71_v8 = vand.u32 4294901760, %v64_v5  ;;  %v658_v24 = vpack.c.bf16 %v547_v23, %v546_v22  ;;  %vm780_vm2 = vmmov 0   ;;  %v641_v32 = vld [vmem:[%s869_s2] ss:$0 sm:$0xff]  ;;  %s781_s26 = smov [#allocation8]  }
  0x3a   :  { %v137_v12 = vsub.f32 %v60_v6, %v136_v9  ;;  %vm549_vm3 = vcmask 195584   ;;  %s631_s27 = sshll.u32 %s781_s26, 4  ;;  %s632_s27 = int_to_ptr.vmem [resolvable:$true] %s631_s27 }
  0x3b   :  { %v148_v10 = vsub.f32 %v67_v4, %v69_v7  ;;  %v154_v11 = vsub.f32 %v64_v5, %v71_v8  ;;  %70 = vmatprep.subr.mxu1 %v69_v7  ;;  %s745_s28 = scalar_lea.vmem %s632_s27, 128  ;;  %p750_p11 = scmp.lt.s32.totalorder %s632_s27, %s632_s27 }
  0x3c   :  { %72 = vmatpush1.msra.mxu1 %v71_v8  ;;  %v138_v13 = vand.u32 4294901760, %v137_v12  ;;  %p746_p10 = scmp.ne.s32.totalorder %s632_s27, %s745_s28  ;;  %p751_p12 = scmp.lt.s32.totalorder %s745_s28, %s745_s28 }
  0x3d   :  { %231 = vmatprep.subr.mxu0 %v148_v10  ;;  %v149_v14 = vand.u32 4294901760, %v148_v10  ;;  %v155_v15 = vand.u32 4294901760, %v154_v11 }
  0x3e   :  { %234 = vmatpush1.msra.mxu0 %v154_v11  ;;  %v139_v16 = vsub.f32 %v137_v12, %v138_v13  ;;  %p752_p13 = por %p751_p12, %p750_p11 }
  0x3f   :  { %300 = vmatmul.mubr.f32.vlgmr.msra.gmra.mrb[0].mxu0 %v137_v12  ;;  %307 = vmatprep.subr.mxu0 %v69_v7  ;;  %v150_v17 = vsub.f32 %v148_v10, %v149_v14  ;;  %v156_v18 = vsub.f32 %v154_v11, %v155_v15 }
  0x40   :  { %309 = vmatpush1.msra.mxu0 %v71_v8  ;;  %372 = vmatprep.mubr.f32.mxu0 %v778_v0  ;;  %v140_v19 = vand.u32 4294901760, %v139_v16  ;;  %p753_p0 = pnand %p752_p13, %p746_p10 }
  0x41   :  { %385 = vmatprep.subr.mxu0 %v149_v14  ;;  %v151_v20 = vand.u32 4294901760, %v150_v17  ;;  %v157_v21 = vand.u32 4294901760, %v156_v18 }
  0x42   :  { %141 = vmatmul.mubr.f32.vlgmr.msra.gmra.mrb[0].mxu1 %v140_v19 }
  0x43   :  { %152 = vmatprep.subr.mxu1 %v151_v20  ;;  %221 = vmatprep.mubr.f32.mxu1 %v778_v0 }
  0x44   :  { %158 = vmatpush1.msra.mxu1 %v157_v21 }
  0x45   :  { %657 = vmatprep.subr.bf16.mxu1 %v779_v25 }
  0x47   :  { %376 = vmatmul.mubr.f32.vlgmr.msra.gmra.mrb[0].mxu0 %v138_v13 }
  0x48   :  { %389 = vmatpush1.msra.mxu0 %v155_v15  ;;  %452 = vmatprep.mubr.f32.mxu0 %v778_v0 }
  0x49   :  { %461 = vmatprep.subr.mxu0 %v69_v7 }
  0x4a   :  { %223 = vmatmul.mubr.f32.vlgmr.msra.gmra.mrb[0].mxu1 %v136_v9 }
  0x4b   :  { %659 = vmatpush3.bf16.msra.mxu1 %v658_v24  ;;  %654 = vmatprep.mubr.msk.f32.mxu1 %vm780_vm2, %v778_v0 }
  0x4c   :  { %652 = vmatprep.subr.mxu1 %v778_v0 }
  0x4f   :  { %454 = vmatmul.mubr.f32.vlgmr.msra.gmra.mrb[0].mxu0 %v136_v9  ;;  %653 = vmatpush3.msra.mxu1 %v548_v26 }
  0x50   :  { %463 = vmatpush1.msra.mxu0 %v71_v8  ;;  %526 = vmatprep.mubr.f32.mxu0 %v778_v0 }
  0x57   :  { %528 = vmatmul.mubr.f32.vlgmr.msra.gmra.mrb[0].mxu0 %v136_v9 }
 0x11d   :  { %v224_v27 = vpop.f32.mrb[0].mxu1 }
 0x11e   :  { %v226_v28 = vpop.f32.mrb[1].mxu1 }
 0x12a   :  { %v529_v29 = vpop.f32.mrb[0].mxu0 }
 0x12b   :  { %v660_v30 = vadd.f32 %v529_v29, %v224_v27  ;;  %v531_v31 = vpop.f32.mrb[1].mxu0 }
 0x12c   :  { %v661_v33 = vadd.f32 %v531_v31, %v226_v28 }
 0x12e   :  { %v541_v34 = vsub.f32 %v661_v33, %v641_v32 }
 0x130   :  { %v542_v35 = vand.u32 2147483647, %v541_v34 }
 0x132   :  { %vm543_vm4 = vcmp.lt.f32.partialorder %v542_v35, 0.5 }
 0x133   :  { %v642_v36 = vsel %vm543_vm4, 1.0, %v778_v0 }
 0x134   :  { %655 = vmatmul.mubr.msk.f32.vlgmr.msra.gmra.mrb[2].mxu1 %vm549_vm3, %v642_v36 }
 0x207   :  { %v619_v37 = vpop.f32.mrb[2].mxu1 }
 0x208   :  { %v623_v38 = vadd.f32 %v660_v30, %v619_v37  ;;  %v656_v39 = vpop.f32.mrb[3].mxu1 }
 0x20a   :  { %624 = vst [vmem:[#allocation8] sm:$0xff] %v623_v38 }
 0x20b   :  { %756 = shalt.err (!%p753_p0)
}
 0x20c   :  { %s757_s30 = scalar_lea.hbm %s871_s4, 128 }
 0x20d   :  { %p758_p1 = scmp.ne.s32.totalorder %s871_s4, %s757_s30  ;;  %p761_p2 = scmp.lt.u32.totalorder %s757_s30, %s871_s4 }
 0x20f   :  { %p763_p3 = pnand %p761_p2, %p758_p1 }
 0x211   :  { %766 = shalt.err (!%p763_p3)
}
 0x212   :  { %634 = dma.vmem_to_hbm [thread:$0]  %s632_s27, 128, %s871_s4, [#allocation4]  }
 0x213   :  { %771 = dma.done.wait [#allocation4], 128  }
 0x214   :  { %772 = vsyncadd [#allocation4], 4294967168 }
 0x215   :  { %638 = vsyncpa [#allocation3], 1 }
 0x216   :  { %639 = vsyncpa [#allocation6], 1 }
 0x217   :  { %640 = vsyncpa [#allocation4], 1 }

// kernel: tpu_custom_call.1
= control target key start
LH: loop header
LB: loop body
LE: loop exit
PB: predicated region body
PF: predicated region fallthrough
CT: control target
= control target key end

     0   :  { %9 = vsyncpa [#allocation3], 0  ;;  %s867_s0 = inlined_call_operand.hbm [shape: f32[8,7], index: 0, kind: input, shape index: {}]   ;;  %s868_s1 = inlined_call_operand.hbm [shape: f32[7,152], index: 1, kind: input, shape index: {}]   ;;  %s869_s2 = inlined_call_operand.vmem [shape: f32[1,24], index: 2, kind: input, shape index: {}]   ;;  %s870_s3 = inlined_call_operand.hbm [shape: f32[24,128], index: 3, kind: input, shape index: {}]   ;;  %s871_s4 = inlined_call_operand.hbm [shape: f32[8,128], index: 4, kind: output, shape index: {}]  }
   0x1   :  { %10 = vsyncpa [#allocation6], 0 }
   0x2   :  { %11 = vsyncpa [#allocation4], 0  ;;  %s773_s15 = smov [#allocation5]   ;;  %s774_s17 = smov [#allocation2]  }
   0x3   :  { %s28_s16 = sshll.u32 %s773_s15, 4  ;;  %s18_s18 = sshll.u32 %s774_s17, 4  ;;  %s29_s16 = int_to_ptr.vmem [resolvable:$true] %s28_s16  ;;  %s19_s18 = int_to_ptr.vmem [resolvable:$true] %s18_s18 }
   0x4   :  { %s679_s21 = scalar_lea.hbm %s868_s1, 256 }
   0x5   :  { %p680_p0 = scmp.ne.s32.totalorder %s868_s1, %s679_s21  ;;  %p683_p1 = scmp.lt.u32.totalorder %s679_s21, %s868_s1 }
   0x7   :  { %p685_p2 = pnand %p683_p1, %p680_p0 }
   0x9   :  { %688 = shalt.err (!%p685_p2)
}
   0xa   :  { %s689_s26 = scalar_lea.vmem %s29_s16, 256  ;;  %p694_p4 = scmp.lt.s32.totalorder %s29_s16, %s29_s16 }
   0xb   :  { %p690_p3 = scmp.ne.s32.totalorder %s29_s16, %s689_s26  ;;  %p695_p5 = scmp.lt.s32.totalorder %s689_s26, %s689_s26 }
   0xd   :  { %p696_p6 = por %p695_p5, %p694_p4 }
   0xf   :  { %p697_p7 = pnand %p696_p6, %p690_p3 }
  0x11   :  { %700 = shalt.err (!%p697_p7)
}
  0x12   :  { %31 = dma.hbm_to_vmem [thread:$0]  %s868_s1, 256, %s29_s16, [#allocation6]  }
  0x13   :  { %s701_s5 = scalar_lea.hbm %s867_s0, 128 }
  0x14   :  { %p702_p8 = scmp.ne.s32.totalorder %s867_s0, %s701_s5  ;;  %p705_p9 = scmp.lt.u32.totalorder %s701_s5, %s867_s0 }
  0x16   :  { %p707_p10 = pnand %p705_p9, %p702_p8 }
  0x18   :  { %710 = shalt.err (!%p707_p10)
}
  0x19   :  { %s711_s10 = scalar_lea.vmem %s19_s18, 128  ;;  %p716_p12 = scmp.lt.s32.totalorder %s19_s18, %s19_s18 }
  0x1a   :  { %p712_p11 = scmp.ne.s32.totalorder %s19_s18, %s711_s10  ;;  %p717_p13 = scmp.lt.s32.totalorder %s711_s10, %s711_s10 }
  0x1c   :  { %p718_p0 = por %p717_p13, %p716_p12 }
  0x1e   :  { %p719_p1 = pnand %p718_p0, %p712_p11 }
  0x20   :  { %722 = shalt.err (!%p719_p1)
}
  0x21   :  { %21 = dma.hbm_to_vmem [thread:$0]  %s867_s0, 128, %s19_s18, [#allocation3]  }
  0x22   :  { %s775_s12 = smov [#allocation7]   ;;  %s723_s16 = scalar_lea.hbm %s870_s3, 384 }
  0x23   :  { %s39_s13 = sshll.u32 %s775_s12, 4  ;;  %p724_p2 = scmp.ne.s32.totalorder %s870_s3, %s723_s16  ;;  %s40_s13 = int_to_ptr.vmem [resolvable:$true] %s39_s13 }
  0x24   :  { %p727_p3 = scmp.lt.u32.totalorder %s723_s16, %s870_s3 }
  0x26   :  { %p729_p4 = pnand %p727_p3, %p724_p2 }
  0x28   :  { %732 = shalt.err (!%p729_p4)
}
  0x29   :  { %s733_s22 = scalar_lea.vmem %s40_s13, 384  ;;  %p738_p6 = scmp.lt.s32.totalorder %s40_s13, %s40_s13 }
  0x2a   :  { %p734_p5 = scmp.ne.s32.totalorder %s40_s13, %s733_s22  ;;  %p739_p7 = scmp.lt.s32.totalorder %s733_s22, %s733_s22 }
  0x2c   :  { %p740_p8 = por %p739_p7, %p738_p6 }
  0x2e   :  { %p741_p9 = pnand %p740_p8, %p734_p5 }
  0x30   :  { %744 = shalt.err (!%p741_p9)
}
  0x31   :  { %s776_s0 = smov 128   ;;  %s777_s18 = smov 8  }
  0x32   :  { %45 = dma.hbm_to_vmem [thread:$0]  %s870_s3, 384, %s40_s13, [#allocation6], %s776_s0, %s776_s0, %s777_s18  }
  0x33   :  { %767 = dma.done.wait [#allocation3], 128  }
  0x34   :  { %768 = vsyncadd [#allocation3], 4294967168 }
  0x35   :  { %769 = dma.done.wait [#allocation6], 640  }
  0x36   :  { %770 = vsyncadd [#allocation6], 4294966656  ;;  %v778_v0 = vmov 0.0   ;;  %vm62_vm0 = vcmask 1046528   ;;  %vm58_vm1 = vcmask 56320   ;;  %v55_v3 = vld [vmem:[#allocation2] sm:$0xff] }
  0x37   :  { %297 = vmatprep.mubr.f32.mxu0 %v778_v0  ;;  %135 = vmatprep.mubr.f32.mxu1 %v778_v0  ;;  %v57_v1 = vld [vmem:[#allocation5 + $0x8] sm:$0x7f]  ;;  %v56_v2 = vld [vmem:[#allocation5] sm:$0x7f]  ;;  %v60_v6 = vsel %vm58_vm1, %v55_v3, 0  ;;  %v546_v22 = vld [vmem:[#allocation7] sm:$0xff] }
  0x38   :  { %v67_v4 = vsel %vm62_vm0, %v57_v1, 0  ;;  %v64_v5 = vsel %vm62_vm0, %v56_v2, 0  ;;  %v136_v9 = vand.u32 4294901760, %v60_v6  ;;  %v547_v23 = vld [vmem:[#allocation7 + $0x8] sm:$0xff]  ;;  %v779_v25 = vmov 0.0|0.0   ;;  %v548_v26 = vld [vmem:[#allocation7 + $0x10] sm:$0xff] }
  0x39   :  { %v69_v7 = vand.u32 4294901760, %v67_v4  ;;  %v71_v8 = vand.u32 4294901760, %v64_v5  ;;  %v658_v24 = vpack.c.bf16 %v547_v23, %v546_v22  ;;  %vm780_vm2 = vmmov 0   ;;  %v641_v32 = vld [vmem:[%s869_s2] ss:$0 sm:$0xff]  ;;  %s781_s26 = smov [#allocation8]  }
  0x3a   :  { %v137_v12 = vsub.f32 %v60_v6, %v136_v9  ;;  %vm549_vm3 = vcmask 195584   ;;  %s631_s27 = sshll.u32 %s781_s26, 4  ;;  %s632_s27 = int_to_ptr.vmem [resolvable:$true] %s631_s27 }
  0x3b   :  { %v148_v10 = vsub.f32 %v67_v4, %v69_v7  ;;  %v154_v11 = vsub.f32 %v64_v5, %v71_v8  ;;  %70 = vmatprep.subr.mxu1 %v69_v7  ;;  %s745_s28 = scalar_lea.vmem %s632_s27, 128  ;;  %p750_p11 = scmp.lt.s32.totalorder %s632_s27, %s632_s27 }
  0x3c   :  { %72 = vmatpush1.msra.mxu1 %v71_v8  ;;  %v138_v13 = vand.u32 4294901760, %v137_v12  ;;  %p746_p10 = scmp.ne.s32.totalorder %s632_s27, %s745_s28  ;;  %p751_p12 = scmp.lt.s32.totalorder %s745_s28, %s745_s28 }
  0x3d   :  { %231 = vmatprep.subr.mxu0 %v148_v10  ;;  %v149_v14 = vand.u32 4294901760, %v148_v10  ;;  %v155_v15 = vand.u32 4294901760, %v154_v11 }
  0x3e   :  { %234 = vmatpush1.msra.mxu0 %v154_v11  ;;  %v139_v16 = vsub.f32 %v137_v12, %v138_v13  ;;  %p752_p13 = por %p751_p12, %p750_p11 }
  0x3f   :  { %300 = vmatmul.mubr.f32.vlgmr.msra.gmra.mrb[0].mxu0 %v137_v12  ;;  %307 = vmatprep.subr.mxu0 %v69_v7  ;;  %v150_v17 = vsub.f32 %v148_v10, %v149_v14  ;;  %v156_v18 = vsub.f32 %v154_v11, %v155_v15 }
  0x40   :  { %309 = vmatpush1.msra.mxu0 %v71_v8  ;;  %372 = vmatprep.mubr.f32.mxu0 %v778_v0  ;;  %v140_v19 = vand.u32 4294901760, %v139_v16  ;;  %p753_p0 = pnand %p752_p13, %p746_p10 }
  0x41   :  { %385 = vmatprep.subr.mxu0 %v149_v14  ;;  %v151_v20 = vand.u32 4294901760, %v150_v17  ;;  %v157_v21 = vand.u32 4294901760, %v156_v18 }
  0x42   :  { %141 = vmatmul.mubr.f32.vlgmr.msra.gmra.mrb[0].mxu1 %v140_v19 }
  0x43   :  { %152 = vmatprep.subr.mxu1 %v151_v20  ;;  %221 = vmatprep.mubr.f32.mxu1 %v778_v0 }
  0x44   :  { %158 = vmatpush1.msra.mxu1 %v157_v21 }
  0x45   :  { %657 = vmatprep.subr.bf16.mxu1 %v779_v25 }
  0x47   :  { %376 = vmatmul.mubr.f32.vlgmr.msra.gmra.mrb[0].mxu0 %v138_v13 }
  0x48   :  { %389 = vmatpush1.msra.mxu0 %v155_v15  ;;  %452 = vmatprep.mubr.f32.mxu0 %v778_v0 }
  0x49   :  { %461 = vmatprep.subr.mxu0 %v69_v7 }
  0x4a   :  { %223 = vmatmul.mubr.f32.vlgmr.msra.gmra.mrb[0].mxu1 %v136_v9 }
  0x4b   :  { %659 = vmatpush3.bf16.msra.mxu1 %v658_v24  ;;  %654 = vmatprep.mubr.msk.f32.mxu1 %vm780_vm2, %v778_v0 }
  0x4c   :  { %652 = vmatprep.subr.mxu1 %v778_v0 }
  0x4f   :  { %454 = vmatmul.mubr.f32.vlgmr.msra.gmra.mrb[0].mxu0 %v136_v9  ;;  %653 = vmatpush3.msra.mxu1 %v548_v26 }
  0x50   :  { %463 = vmatpush1.msra.mxu0 %v71_v8  ;;  %526 = vmatprep.mubr.f32.mxu0 %v778_v0 }
  0x57   :  { %528 = vmatmul.mubr.f32.vlgmr.msra.gmra.mrb[0].mxu0 %v136_v9 }
 0x11d   :  { %v224_v27 = vpop.f32.mrb[0].mxu1 }
 0x11e   :  { %v226_v28 = vpop.f32.mrb[1].mxu1 }
 0x12a   :  { %v529_v29 = vpop.f32.mrb[0].mxu0 }
 0x12b   :  { %v660_v30 = vadd.f32 %v529_v29, %v224_v27  ;;  %v531_v31 = vpop.f32.mrb[1].mxu0 }
 0x12c   :  { %v661_v33 = vadd.f32 %v531_v31, %v226_v28 }
 0x12e   :  { %v541_v34 = vsub.f32 %v661_v33, %v641_v32 }
 0x130   :  { %v542_v35 = vand.u32 2147483647, %v541_v34 }
 0x132   :  { %vm543_vm4 = vcmp.lt.f32.partialorder %v542_v35, 0.5 }
 0x133   :  { %v642_v36 = vsel %vm543_vm4, 1.0, %v778_v0 }
 0x134   :  { %655 = vmatmul.mubr.msk.f32.vlgmr.msra.gmra.mrb[2].mxu1 %vm549_vm3, %v642_v36 }
 0x207   :  { %v619_v37 = vpop.f32.mrb[2].mxu1 }
 0x208   :  { %v623_v38 = vadd.f32 %v660_v30, %v619_v37  ;;  %v656_v39 = vpop.f32.mrb[3].mxu1 }
 0x20a   :  { %624 = vst [vmem:[#allocation8] sm:$0xff] %v623_v38 }
 0x20b   :  { %756 = shalt.err (!%p753_p0)
}
 0x20c   :  { %s757_s30 = scalar_lea.hbm %s871_s4, 128 }
 0x20d   :  { %p758_p1 = scmp.ne.s32.totalorder %s871_s4, %s757_s30  ;;  %p761_p2 = scmp.lt.u32.totalorder %s757_s30, %s871_s4 }
 0x20f   :  { %p763_p3 = pnand %p761_p2, %p758_p1 }
 0x211   :  { %766 = shalt.err (!%p763_p3)
}
 0x212   :  { %634 = dma.vmem_to_hbm [thread:$0]  %s632_s27, 128, %s871_s4, [#allocation4]  }
 0x213   :  { %771 = dma.done.wait [#allocation4], 128  }
 0x214   :  { %772 = vsyncadd [#allocation4], 4294967168 }
 0x215   :  { %638 = vsyncpa [#allocation3], 1 }
 0x216   :  { %639 = vsyncpa [#allocation6], 1 }
 0x217   :  { %640 = vsyncpa [#allocation4], 1 }

// kernel: tpu_custom_call.1
= control target key start
LH: loop header
LB: loop body
LE: loop exit
PB: predicated region body
PF: predicated region fallthrough
CT: control target
= control target key end

     0   :  { %9 = vsyncpa [#allocation3], 0  ;;  %s457_s0 = inlined_call_operand.hbm [shape: f32[8,7], index: 0, kind: input, shape index: {}]   ;;  %s458_s1 = inlined_call_operand.hbm [shape: f32[7,152], index: 1, kind: input, shape index: {}]   ;;  %s459_s2 = inlined_call_operand.vmem [shape: f32[1,24], index: 2, kind: input, shape index: {}]   ;;  %s460_s3 = inlined_call_operand.hbm [shape: f32[24,128], index: 3, kind: input, shape index: {}]   ;;  %s461_s4 = inlined_call_operand.hbm [shape: f32[8,128], index: 4, kind: output, shape index: {}]  }
   0x1   :  { %10 = vsyncpa [#allocation6], 0 }
   0x2   :  { %11 = vsyncpa [#allocation4], 0  ;;  %s372_s15 = smov [#allocation5]   ;;  %s373_s17 = smov [#allocation2]  }
   0x3   :  { %s28_s16 = sshll.u32 %s372_s15, 4  ;;  %s18_s18 = sshll.u32 %s373_s17, 4  ;;  %s29_s16 = int_to_ptr.vmem [resolvable:$true] %s28_s16  ;;  %s19_s18 = int_to_ptr.vmem [resolvable:$true] %s18_s18 }
   0x4   :  { %s278_s21 = scalar_lea.hbm %s458_s1, 256 }
   0x5   :  { %p279_p0 = scmp.ne.s32.totalorder %s458_s1, %s278_s21  ;;  %p282_p1 = scmp.lt.u32.totalorder %s278_s21, %s458_s1 }
   0x7   :  { %p284_p2 = pnand %p282_p1, %p279_p0 }
   0x9   :  { %287 = shalt.err (!%p284_p2)
}
   0xa   :  { %s288_s26 = scalar_lea.vmem %s29_s16, 256  ;;  %p293_p4 = scmp.lt.s32.totalorder %s29_s16, %s29_s16 }
   0xb   :  { %p289_p3 = scmp.ne.s32.totalorder %s29_s16, %s288_s26  ;;  %p294_p5 = scmp.lt.s32.totalorder %s288_s26, %s288_s26 }
   0xd   :  { %p295_p6 = por %p294_p5, %p293_p4 }
   0xf   :  { %p296_p7 = pnand %p295_p6, %p289_p3 }
  0x11   :  { %299 = shalt.err (!%p296_p7)
}
  0x12   :  { %31 = dma.hbm_to_vmem [thread:$0]  %s458_s1, 256, %s29_s16, [#allocation6]  }
  0x13   :  { %s300_s5 = scalar_lea.hbm %s457_s0, 128 }
  0x14   :  { %p301_p8 = scmp.ne.s32.totalorder %s457_s0, %s300_s5  ;;  %p304_p9 = scmp.lt.u32.totalorder %s300_s5, %s457_s0 }
  0x16   :  { %p306_p10 = pnand %p304_p9, %p301_p8 }
  0x18   :  { %309 = shalt.err (!%p306_p10)
}
  0x19   :  { %s310_s10 = scalar_lea.vmem %s19_s18, 128  ;;  %p315_p12 = scmp.lt.s32.totalorder %s19_s18, %s19_s18 }
  0x1a   :  { %p311_p11 = scmp.ne.s32.totalorder %s19_s18, %s310_s10  ;;  %p316_p13 = scmp.lt.s32.totalorder %s310_s10, %s310_s10 }
  0x1c   :  { %p317_p0 = por %p316_p13, %p315_p12 }
  0x1e   :  { %p318_p1 = pnand %p317_p0, %p311_p11 }
  0x20   :  { %321 = shalt.err (!%p318_p1)
}
  0x21   :  { %21 = dma.hbm_to_vmem [thread:$0]  %s457_s0, 128, %s19_s18, [#allocation3]  }
  0x22   :  { %s374_s12 = smov [#allocation7]   ;;  %s322_s16 = scalar_lea.hbm %s460_s3, 384 }
  0x23   :  { %s39_s13 = sshll.u32 %s374_s12, 4  ;;  %p323_p2 = scmp.ne.s32.totalorder %s460_s3, %s322_s16  ;;  %s40_s13 = int_to_ptr.vmem [resolvable:$true] %s39_s13 }
  0x24   :  { %p326_p3 = scmp.lt.u32.totalorder %s322_s16, %s460_s3 }
  0x26   :  { %p328_p4 = pnand %p326_p3, %p323_p2 }
  0x28   :  { %331 = shalt.err (!%p328_p4)
}
  0x29   :  { %s332_s22 = scalar_lea.vmem %s40_s13, 384  ;;  %p337_p6 = scmp.lt.s32.totalorder %s40_s13, %s40_s13 }
  0x2a   :  { %p333_p5 = scmp.ne.s32.totalorder %s40_s13, %s332_s22  ;;  %p338_p7 = scmp.lt.s32.totalorder %s332_s22, %s332_s22 }
  0x2c   :  { %p339_p8 = por %p338_p7, %p337_p6 }
  0x2e   :  { %p340_p9 = pnand %p339_p8, %p333_p5 }
  0x30   :  { %343 = shalt.err (!%p340_p9)
}
  0x31   :  { %s375_s0 = smov 128   ;;  %s376_s18 = smov 8  }
  0x32   :  { %45 = dma.hbm_to_vmem [thread:$0]  %s460_s3, 384, %s40_s13, [#allocation6], %s375_s0, %s375_s0, %s376_s18  }
  0x33   :  { %366 = dma.done.wait [#allocation3], 128  }
  0x34   :  { %367 = vsyncadd [#allocation3], 4294967168 }
  0x35   :  { %368 = dma.done.wait [#allocation6], 640  }
  0x36   :  { %369 = vsyncadd [#allocation6], 4294966656  ;;  %v377_v0 = vmov 0.0   ;;  %vm62_vm0 = vcmask 1046528   ;;  %v57_v1 = vld [vmem:[#allocation5 + $0x8] sm:$0x7f] }
  0x37   :  { %133 = vmatprep.mubr.f32.mxu0 %v377_v0  ;;  %v56_v2 = vld [vmem:[#allocation5] sm:$0x7f]  ;;  %v55_v3 = vld [vmem:[#allocation2] sm:$0xff]  ;;  %vm58_vm1 = vcmask 56320   ;;  %247 = vmatprep.subr.msk.mxu0 %vm62_vm0, %v57_v1  ;;  %v152_v4 = vld [vmem:[#allocation7] sm:$0xff]  ;;  %v378_v7 = vmov 0.0|0.0  }
  0x38   :  { %248 = vmatpush1.msk.msra.mxu0 %vm62_vm0, %v56_v2  ;;  %v153_v5 = vld [vmem:[#allocation7 + $0x8] sm:$0xff]  ;;  %266 = vmatprep.subr.bf16.mxu1 %v378_v7  ;;  %v154_v8 = vld [vmem:[#allocation7 + $0x10] sm:$0xff]  ;;  %vm379_vm2 = vmmov 0   ;;  %vm155_vm3 = vcmask 195584   ;;  %s380_s26 = smov [#allocation8]  }
  0x39   :  { %249 = vmatmul.mubr.msk.f32.vlgmr.msra.gmra.mrb[0].mxu0 %vm58_vm1, %v55_v3  ;;  %v267_v6 = vpack.c.bf16 %v153_v5, %v152_v4  ;;  %263 = vmatprep.mubr.msk.f32.mxu1 %vm379_vm2, %v377_v0  ;;  %v250_v9 = vld [vmem:[%s459_s2] ss:$0 sm:$0xff]  ;;  %s237_s27 = sshll.u32 %s380_s26, 4  ;;  %s238_s27 = int_to_ptr.vmem [resolvable:$true] %s237_s27 }
  0x3a   :  { %s344_s28 = scalar_lea.vmem %s238_s27, 128  ;;  %p349_p11 = scmp.lt.s32.totalorder %s238_s27, %s238_s27 }
  0x3b   :  { %268 = vmatpush3.bf16.msra.mxu1 %v267_v6  ;;  %p345_p10 = scmp.ne.s32.totalorder %s238_s27, %s344_s28  ;;  %p350_p12 = scmp.lt.s32.totalorder %s344_s28, %s344_s28 }
  0x3c   :  { %261 = vmatprep.subr.mxu1 %v377_v0 }
  0x3d   :  { %p351_p13 = por %p350_p12, %p349_p11 }
  0x3f   :  { %262 = vmatpush3.msra.mxu1 %v154_v8  ;;  %p352_p0 = pnand %p351_p13, %p345_p10 }
 0x10c   :  { %v135_v10 = vpop.f32.mrb[0].mxu0 }
 0x10d   :  { %v137_v11 = vpop.f32.mrb[1].mxu0 }
 0x10e   :  { %v147_v12 = vsub.f32 %v137_v11, %v250_v9 }
 0x110   :  { %v148_v13 = vand.u32 2147483647, %v147_v12 }
 0x112   :  { %vm149_vm4 = vcmp.lt.f32.partialorder %v148_v13, 0.5 }
 0x113   :  { %v251_v14 = vsel %vm149_vm4, 1.0, %v377_v0 }
 0x114   :  { %264 = vmatmul.mubr.msk.f32.vlgmr.msra.gmra.mrb[0].mxu1 %vm155_vm3, %v251_v14 }
 0x1e7   :  { %v225_v15 = vpop.f32.mrb[0].mxu1 }
 0x1e8   :  { %v229_v16 = vadd.f32 %v225_v15, %v135_v10  ;;  %v265_v17 = vpop.f32.mrb[1].mxu1 }
 0x1ea   :  { %230 = vst [vmem:[#allocation8] sm:$0xff] %v229_v16 }
 0x1eb   :  { %355 = shalt.err (!%p352_p0)
}
 0x1ec   :  { %s356_s30 = scalar_lea.hbm %s461_s4, 128 }
 0x1ed   :  { %p357_p1 = scmp.ne.s32.totalorder %s461_s4, %s356_s30  ;;  %p360_p2 = scmp.lt.u32.totalorder %s356_s30, %s461_s4 }
 0x1ef   :  { %p362_p3 = pnand %p360_p2, %p357_p1 }
 0x1f1   :  { %365 = shalt.err (!%p362_p3)
}
 0x1f2   :  { %240 = dma.vmem_to_hbm [thread:$0]  %s238_s27, 128, %s461_s4, [#allocation4]  }
 0x1f3   :  { %370 = dma.done.wait [#allocation4], 128  }
 0x1f4   :  { %371 = vsyncadd [#allocation4], 4294967168 }
 0x1f5   :  { %244 = vsyncpa [#allocation3], 1 }
 0x1f6   :  { %245 = vsyncpa [#allocation6], 1 }
 0x1f7   :  { %246 = vsyncpa [#allocation4], 1 }

</bundles_post_ra>
